<compile_context>
chip_gen: v6e
topology: v6e:2x2x1
jax: 0.10.0
libtpu: 0.0.40
codegen_flags: <defaults>
</compile_context>

<pallas_src>
import math

import jax
import jax.numpy as jnp
from jax import lax
from jax.experimental import pallas as pl
from jax.experimental.pallas import tpu as pltpu

_LANE = 128          # lane width (last dim of a vreg)
_SUBLANE = 8         # f32 sublane count
_LN2 = math.log(2.0)


def _round_up(x, m):
    return ((x + m - 1) // m) * m


def _log_cosh_f32(diff):
    # Overflow-safe identity: log(cosh(x)) = |x| + log1p(exp(-2|x|)) - log(2).
    a = jnp.abs(diff + 1e-12)
    return a + jnp.log1p(jnp.exp(-2.0 * a)) - _LN2


def _tuning():
    """Generation-dispatched (block_rows, vmem_limit_bytes)."""
    try:
        vmem_cap = int(pltpu.get_tpu_info().vmem_capacity_bytes)
    except Exception:
        vmem_cap = 64 * 1024 * 1024  # conservative: v7x per-TC budget
    if vmem_cap >= 96 * 1024 * 1024:
        # v5e / v6e: 128 MiB physical VMEM.
        return 8192, 64 * 1024 * 1024
    # v7x: 64 MiB per TensorCore -> keep headroom.
    return 4096, 32 * 1024 * 1024


def log_cosh_loss(y_pred, y_true):
    assert y_pred.shape == y_true.shape, "shapes must match (no broadcasting needed)"
    n_elem = y_pred.size
    out_dtype = jnp.result_type(y_pred.dtype, y_true.dtype)

    p_flat = jnp.ravel(y_pred)   # free reshape of a contiguous array
    t_flat = jnp.ravel(y_true)

    rows = n_elem // _LANE       # number of full 128-lane rows
    n_aligned = rows * _LANE
    n_tail = n_elem - n_aligned  # <=127 leftover elements

    total = jnp.zeros((), jnp.float32)

    if rows > 0:
        if n_tail:
            # Prefix slice only in the unaligned case; aligned inputs pay nothing.
            p2 = p_flat[:n_aligned].reshape(rows, _LANE)
            t2 = t_flat[:n_aligned].reshape(rows, _LANE)
        else:
            p2 = p_flat.reshape(rows, _LANE)
            t2 = t_flat.reshape(rows, _LANE)

        block_rows, vmem_limit = _tuning()

        # Sublane multiple for the narrowest streamed dtype (f32:8, bf16:16, int8:32)
        # so packed-dtype tiling minimums are never violated for tiny inputs.
        min_itemsize = min(jnp.dtype(p2.dtype).itemsize, jnp.dtype(t2.dtype).itemsize)
        sub = _SUBLANE * max(1, 4 // max(1, min_itemsize))

        tm = min(block_rows, _round_up(rows, sub))
        num_blocks = -(-rows // tm)                       # ceil-div
        # Leading "parallel" axis: shards the stream across v7x's 2 TCs; a
        # harmless serial 2-pass on v5e/v6e.  Dropped entirely for tiny inputs.
        n_splits = 2 if num_blocks >= 2 else 1
        bpc = -(-num_blocks // n_splits)                  # row-blocks per split

        partial_last = (rows % tm) != 0
        needs_mask = partial_last or (num_blocks % n_splits != 0)

        def index_map(c, i):
            # Clamp so the auto-generated DMA window always stays inside the
            # array; clamped duplicate blocks are zeroed by the edge mask.
            return (jnp.minimum(c * bpc + i, num_blocks - 1), 0)

        def kernel(pred_ref, true_ref, out_ref):
            c = pl.program_id(0)
            i = pl.program_id(1)

            @pl.when(i == 0)
            def _():
                out_ref[...] = jnp.zeros_like(out_ref)

            val = _log_cosh_f32(
                true_ref[...].astype(jnp.float32) - pred_ref[...].astype(jnp.float32)
            )

            def fold(v):
                # (tm, 128) -> vreg-shaped (1, 8, 128) partial sum (pure VPU adds).
                return jnp.sum(v.reshape(tm // _SUBLANE, _SUBLANE, _LANE), axis=0)[None]

            if needs_mask:
                # Invariant: the mask is built from the UN-clamped block index so
                # contributions of clamped/duplicated data are zeroed.
                intended = c * bpc + i
                edge_at = (num_blocks - 1) if partial_last else num_blocks
                is_edge = intended >= edge_at

                @pl.when(jnp.logical_not(is_edge))
                def _():  # interior blocks: mask-free fast path
                    out_ref[...] += fold(val)

                @pl.when(is_edge)
                def _():  # at most one partial block + clamped duplicates
                    base_row = intended * tm
                    row_idx = base_row + lax.broadcasted_iota(
                        jnp.int32, (tm, _LANE), 0
                    )
                    out_ref[...] += fold(jnp.where(row_idx < rows, val, 0.0))
            else:
                out_ref[...] += fold(val)

        bytes_per_elem = (
            jnp.dtype(p2.dtype).itemsize + jnp.dtype(t2.dtype).itemsize
        )
        partials = pl.pallas_call(
            kernel,
            out_shape=jax.ShapeDtypeStruct((n_splits, _SUBLANE, _LANE), jnp.float32),
            grid_spec=pltpu.PrefetchScalarGridSpec(
                num_scalar_prefetch=0,
                grid=(n_splits, bpc),
                in_specs=[
                    pl.BlockSpec((tm, _LANE), index_map),
                    pl.BlockSpec((tm, _LANE), index_map),
                ],
                out_specs=pl.BlockSpec((1, _SUBLANE, _LANE), lambda c, i: (c, 0, 0)),
            ),
            compiler_params=pltpu.CompilerParams(
                # TODO(synk): confirm on v7x xprof that this "parallel" axis shards
                # across both TensorCores; if one TC is idle, switch to CORE_PARALLEL.
                dimension_semantics=("parallel", "arbitrary"),
                vmem_limit_bytes=vmem_limit,
            ),
            cost_estimate=pl.CostEstimate(
                flops=8 * n_aligned,
                transcendentals=2 * n_aligned,
                bytes_accessed=bytes_per_elem * n_aligned,
            ),
        )(p2, t2)

        total = total + jnp.sum(partials)

    if n_tail:
        # Tiny (<128-element) tail folded in with plain JAX — no padding anywhere.
        total = total + jnp.sum(
            _log_cosh_f32(
                t_flat[n_aligned:].astype(jnp.float32)
                - p_flat[n_aligned:].astype(jnp.float32)
            )
        )

    return (total / n_elem).astype(out_dtype)


if __name__ == "__main__":
    key = jax.random.PRNGKey(0)
    k1, k2 = jax.random.split(key)
    # NCHW-style inputs, as the PyTorch module would see them.
    y_pred = jax.random.normal(k1, (2, 4, 16, 16), dtype=jnp.float32)
    y_true = jax.random.normal(k2, (2, 4, 16, 16), dtype=jnp.float32)

    loss = jax.block_until_ready(log_cosh_loss(y_pred, y_true))

    # Pure-JAX reference check (direct formula is safe at these magnitudes).
    ref = jnp.mean(jnp.log(jnp.cosh((y_true - y_pred) + 1e-12)))
    assert jnp.allclose(loss, ref, rtol=1e-5, atol=1e-6), (loss, ref)

    print("KERNEL_OK")
</pallas_src>

<mosaic_0001>
module attributes {stable_mosaic.version = 11 : i64} {
  func.func @kernel(%arg0: i32, %arg1: i32, %arg2: memref<16x128xf32, #tpu.memory_space<vmem>>, %arg3: memref<16x128xf32, #tpu.memory_space<vmem>>, %arg4: memref<1x8x128xf32, #tpu.memory_space<vmem>>) attributes {dimension_semantics = [#tpu.dimension_semantics<parallel>, #tpu.dimension_semantics<arbitrary>], iteration_bounds = array<i64: 1, 1>, scalar_prefetch = 0 : i64, scratch_operands = 0 : i64, tpu.core_type = #tpu.core_type<tc>, window_params = [{transform_indices = @transform_0, window_bounds = array<i64: 16, 128>}, {transform_indices = @transform_1, window_bounds = array<i64: 16, 128>}, {transform_indices = @transform_2, window_bounds = array<i64: 1, 8, 128>}]} {
    %c0_i32 = arith.constant 0 : i32
    %0 = arith.cmpi eq, %arg1, %c0_i32 : i32
    %1 = arith.extui %0 : i1 to i32
    %c0_i32_0 = arith.constant 0 : i32
    %2 = arith.cmpi ne, %1, %c0_i32_0 : i32
    scf.if %2 {
      %cst_13 = arith.constant 0.000000e+00 : f32
      %22 = vector.broadcast %cst_13 : f32 to vector<1x8x128xf32>
      %c0_14 = arith.constant 0 : index
      %c0_15 = arith.constant 0 : index
      %c0_16 = arith.constant 0 : index
      %23 = vector.load %arg4[%c0_14, %c0_15, %c0_16] : memref<1x8x128xf32, #tpu.memory_space<vmem>>, vector<1x8x128xf32>
      tpu.vector_store %arg4[%c0_14, %c0_15, %c0_16], %22 {strides = array<i32>} : memref<1x8x128xf32, #tpu.memory_space<vmem>>, vector<1x8x128xf32>,
    } else {
    }
    %c0 = arith.constant 0 : index
    %c0_1 = arith.constant 0 : index
    %3 = vector.load %arg3[%c0, %c0_1] : memref<16x128xf32, #tpu.memory_space<vmem>>, vector<16x128xf32>
    %c0_2 = arith.constant 0 : index
    %c0_3 = arith.constant 0 : index
    %4 = vector.load %arg2[%c0_2, %c0_3] : memref<16x128xf32, #tpu.memory_space<vmem>>, vector<16x128xf32>
    %5 = arith.subf %3, %4 : vector<16x128xf32>
    %cst = arith.constant 9.99999996E-13 : f32
    %6 = vector.broadcast %cst : f32 to vector<16x128xf32>
    %7 = arith.addf %5, %6 : vector<16x128xf32>
    %8 = math.absf %7 : vector<16x128xf32>
    %cst_4 = arith.constant -2.000000e+00 : f32
    %9 = vector.broadcast %cst_4 : f32 to vector<16x128xf32>
    %10 = arith.mulf %9, %8 : vector<16x128xf32>
    %11 = math.exp %10 : vector<16x128xf32>
    %12 = math.log1p %11 : vector<16x128xf32>
    %13 = arith.addf %8, %12 : vector<16x128xf32>
    %cst_5 = arith.constant 0.693147182 : f32
    %14 = vector.broadcast %cst_5 : f32 to vector<16x128xf32>
    %15 = arith.subf %13, %14 : vector<16x128xf32>
    %c0_6 = arith.constant 0 : index
    %c0_7 = arith.constant 0 : index
    %c0_8 = arith.constant 0 : index
    %16 = vector.load %arg4[%c0_6, %c0_7, %c0_8] : memref<1x8x128xf32, #tpu.memory_space<vmem>>, vector<1x8x128xf32>
    %17 = vector.shape_cast %15 : vector<16x128xf32> to vector<2x8x128xf32>
    %cst_9 = arith.constant dense<0.000000e+00> : vector<8x128xf32>
    %18 = vector.multi_reduction <add>, %17, %cst_9 [0] : vector<2x8x128xf32> to vector<8x128xf32>
    %19 = vector.shape_cast %18 : vector<8x128xf32> to vector<1x8x128xf32>
    %20 = arith.addf %16, %19 : vector<1x8x128xf32>
    %c0_10 = arith.constant 0 : index
    %c0_11 = arith.constant 0 : index
    %c0_12 = arith.constant 0 : index
    %21 = vector.load %arg4[%c0_10, %c0_11, %c0_12] : memref<1x8x128xf32, #tpu.memory_space<vmem>>, vector<1x8x128xf32>
    tpu.vector_store %arg4[%c0_10, %c0_11, %c0_12], %20 {strides = array<i32>} : memref<1x8x128xf32, #tpu.memory_space<vmem>>, vector<1x8x128xf32>,
    return
  }
  func.func @transform_0(%arg0: i32, %arg1: i32) -> (i32, i32) {
    %c1_i32 = arith.constant 1 : i32
    %0 = arith.muli %arg0, %c1_i32 : i32
    %1 = arith.addi %0, %arg1 : i32
    %c0_i32 = arith.constant 0 : i32
    %2 = arith.minsi %1, %c0_i32 : i32
    %c0_i32_0 = arith.constant 0 : i32
    %c0_i32_1 = arith.constant 0 : i32
    return %2, %c0_i32_0 : i32, i32
  }
  func.func @transform_1(%arg0: i32, %arg1: i32) -> (i32, i32) {
    %c1_i32 = arith.constant 1 : i32
    %0 = arith.muli %arg0, %c1_i32 : i32
    %1 = arith.addi %0, %arg1 : i32
    %c0_i32 = arith.constant 0 : i32
    %2 = arith.minsi %1, %c0_i32 : i32
    %c0_i32_0 = arith.constant 0 : i32
    %c0_i32_1 = arith.constant 0 : i32
    return %2, %c0_i32_0 : i32, i32
  }
  func.func @transform_2(%arg0: i32, %arg1: i32) -> (i32, i32, i32) {
    %c0_i32 = arith.constant 0 : i32
    %c0_i32_0 = arith.constant 0 : i32
    %c0_i32_1 = arith.constant 0 : i32
    return %arg0, %c0_i32, %c0_i32_0 : i32, i32, i32
  }
}

</mosaic_0001>

<bundles_post_ra>
// kernel: tpu_custom_call.1
= control target key start
LH: loop header
LB: loop body
LE: loop exit
PB: predicated region body
PF: predicated region fallthrough
CT: control target
= control target key end

     0   :  { %7 = vsyncpa [#allocation3], 0  ;;  %s238_s0 = inlined_call_operand.hbm [shape: f32[16,128], index: 0, kind: input, shape index: {}]   ;;  %s239_s1 = inlined_call_operand.hbm [shape: f32[16,128], index: 1, kind: input, shape index: {}]   ;;  %s240_s2 = inlined_call_operand.hbm [shape: f32[1,8,128], index: 2, kind: output, shape index: {}]  }
   0x1   :  { %8 = vsyncpa [#allocation6], 0 }
   0x2   :  { %9 = vsyncpa [#allocation4], 0  ;;  %s209_s9 = smov [#allocation2]  }
   0x3   :  { %s21_s10 = sshll.u32 %s209_s9, 4  ;;  %s22_s10 = int_to_ptr.vmem [resolvable:$true] %s21_s10 }
   0x4   :  { %s151_s11 = scalar_lea.vmem %s22_s10, 256  ;;  %p156_p1 = scmp.lt.s32.totalorder %s22_s10, %s22_s10 }
   0x5   :  { %p152_p0 = scmp.ne.s32.totalorder %s22_s10, %s151_s11  ;;  %p157_p2 = scmp.lt.s32.totalorder %s151_s11, %s151_s11 }
   0x7   :  { %p158_p3 = por %p157_p2, %p156_p1 }
   0x9   :  { %p159_p4 = pnand %p158_p3, %p152_p0 }
   0xb   :  { %162 = shalt.err (!%p159_p4)
}
   0xc   :  { %s210_s12 = smov 128   ;;  %s211_s13 = smov 8  }
   0xd   :  { %27 = dma.hbm_to_vmem [thread:$0]  %s238_s0, 256, %s22_s10, [#allocation3], %s210_s12, %s210_s12, %s211_s13  }
   0xe   :  { %s212_s16 = smov [#allocation5]  }
   0xf   :  { %s39_s17 = sshll.u32 %s212_s16, 4  ;;  %s40_s17 = int_to_ptr.vmem [resolvable:$true] %s39_s17 }
  0x10   :  { %s171_s18 = scalar_lea.vmem %s40_s17, 256  ;;  %p176_p6 = scmp.lt.s32.totalorder %s40_s17, %s40_s17 }
  0x11   :  { %p172_p5 = scmp.ne.s32.totalorder %s40_s17, %s171_s18  ;;  %p177_p7 = scmp.lt.s32.totalorder %s171_s18, %s171_s18 }
  0x13   :  { %p178_p8 = por %p177_p7, %p176_p6 }
  0x15   :  { %p179_p9 = pnand %p178_p8, %p172_p5 }
  0x17   :  { %182 = shalt.err (!%p179_p9)
}
  0x18   :  { %45 = dma.hbm_to_vmem [thread:$0]  %s239_s1, 256, %s40_s17, [#allocation6], %s210_s12, %s210_s12, %s211_s13  }
  0x19   :  { %203 = dma.done.wait [#allocation3], 256  }
  0x1a   :  { %204 = vsyncadd [#allocation3], 4294967040 }
  0x1b   :  { %205 = dma.done.wait [#allocation6], 256  }
  0x1c   :  { %206 = vsyncadd [#allocation6], 4294967040  ;;  %v65_v0 = vld [vmem:[#allocation5] sm:$0xff]  ;;  %v66_v1 = vld [vmem:[#allocation5 + $0x8] sm:$0xff]  ;;  %s213_s0 = smov [#allocation7]  }
  0x1d   :  { %v67_v2 = vld [vmem:[#allocation2] sm:$0xff]  ;;  %v68_v3 = vld [vmem:[#allocation2 + $0x8] sm:$0xff]  ;;  %s113_s1 = sshll.u32 %s213_s0, 4  ;;  %s114_s1 = int_to_ptr.vmem [resolvable:$true] %s113_s1 }
  0x1e   :  { %v69_v4 = vsub.f32 %v65_v0, %v67_v2  ;;  %v70_v5 = vsub.f32 %v66_v1, %v68_v3  ;;  %s183_s21 = scalar_lea.vmem %s114_s1, 128  ;;  %p188_p11 = scmp.lt.s32.totalorder %s114_s1, %s114_s1 }
  0x1f   :  { %p184_p10 = scmp.ne.s32.totalorder %s114_s1, %s183_s21  ;;  %p189_p12 = scmp.lt.s32.totalorder %s183_s21, %s183_s21 }
  0x20   :  { %v71_v6 = vadd.f32 1e-12, %v69_v4  ;;  %v72_v7 = vadd.f32 1e-12, %v70_v5 }
  0x21   :  { %p190_p13 = por %p189_p12, %p188_p11 }
  0x22   :  { %v73_v8 = vand.u32 2147483647, %v71_v6  ;;  %v74_v9 = vand.u32 2147483647, %v72_v7 }
  0x23   :  { %p191_p0 = pnand %p190_p13, %p184_p10 }
  0x24   :  { %v75_v10 = vmul.f32 -2.0, %v73_v8  ;;  %v76_v11 = vmul.f32 -2.0, %v74_v9 }
  0x26   :  { %v77_v12 = vmul.f32 1.442695, %v75_v10  ;;  %v79_v13 = vmul.f32 1.442695, %v76_v11 }
  0x28   :  { %135 = vpow2.f32 %v77_v12 }
  0x29   :  { %137 = vpow2.f32 %v79_v13 }
  0x35   :  { %v136_v14 = vpop.eup %135 }
  0x36   :  { %v138_v15 = vpop.eup %137  ;;  %v81_v16 = vadd.f32 1.0, %v136_v14  ;;  %v84_v18 = vmul.f32 -0.5, %v136_v14  ;;  %v87_v21 = vand.u32 2147483647, %v136_v14 }
  0x37   :  { %v90_v17 = vadd.f32 1.0, %v138_v15  ;;  %v93_v19 = vmul.f32 -0.5, %v138_v15  ;;  %v96_v23 = vand.u32 2147483647, %v138_v15 }
  0x38   :  { %139 = vlog2.f32 %v81_v16  ;;  %v85_v20 = vadd.f32 1.0, %v84_v18  ;;  %vm88_vm0 = vcmp.lt.f32.partialorder %v87_v21, 0.0004427343 }
  0x39   :  { %141 = vlog2.f32 %v90_v17  ;;  %v94_v22 = vadd.f32 1.0, %v93_v19  ;;  %vm97_vm1 = vcmp.lt.f32.partialorder %v96_v23, 0.0004427343 }
  0x3a   :  { %v86_v24 = vmul.f32 %v136_v14, %v85_v20 }
  0x3b   :  { %v95_v26 = vmul.f32 %v138_v15, %v94_v22 }
  0x45   :  { %v140_v25 = vpop.eup %139 }
  0x46   :  { %v142_v27 = vpop.eup %141  ;;  %v83_v28 = vmul.f32 0.6931472, %v140_v25 }
  0x47   :  { %v92_v29 = vmul.f32 0.6931472, %v142_v27 }
  0x48   :  { %v89_v30 = vsel %vm88_vm0, %v86_v24, %v83_v28 }
  0x49   :  { %v98_v31 = vsel %vm97_vm1, %v95_v26, %v92_v29  ;;  %v99_v32 = vadd.f32 %v89_v30, %v73_v8 }
  0x4a   :  { %v100_v33 = vadd.f32 %v98_v31, %v74_v9 }
  0x4b   :  { %v127_v34 = vadd.f32 -0.6931472, %v99_v32 }
  0x4c   :  { %v128_v35 = vadd.f32 -0.6931472, %v100_v33 }
  0x4e   :  { %v104_v36 = vadd.f32 %v128_v35, %v127_v34 }
  0x50   :  { %106 = vst [vmem:[#allocation7] sm:$0xff] %v104_v36 }
  0x51   :  { %194 = shalt.err (!%p191_p0)
}
  0x52   :  { %116 = dma.vmem_to_hbm [thread:$0]  %s114_s1, 128, %s240_s2, [#allocation4]  }
  0x53   :  { %207 = dma.done.wait [#allocation4], 128  }
  0x54   :  { %208 = vsyncadd [#allocation4], 4294967168 }
  0x55   :  { %120 = vsyncpa [#allocation3], 1 }
  0x56   :  { %121 = vsyncpa [#allocation6], 1 }
  0x57   :  { %122 = vsyncpa [#allocation4], 1 }

</bundles_post_ra>
